<compile_context>
chip_gen: v5e
topology: v5e:2x2
jax: 0.10.0
libtpu: 0.0.40
codegen_flags: <defaults>
</compile_context>

<pallas_src>
import jax
import jax.numpy as jnp
from jax.experimental import pallas as pl
from jax.experimental.pallas import tpu as pltpu


def _vmem_config():
    """Returns (vmem_limit_bytes, tile_budget_bytes), generation-aware."""
    phys = 64 << 20  # conservative default = v7x per-core VMEM
    try:
        phys = int(pltpu.get_tpu_info().vmem_capacity_bytes) or phys
    except Exception:
        pass
    vmem_limit = min(phys // 2, 64 << 20)   # 32 MiB on v7x, 64 MiB on v5e/v6e
    tile_budget = phys // 8                 # 8 MiB on v7x, 16 MiB on v5e/v6e
    return vmem_limit, tile_budget


def _choose_hw_tile(HW, C, itemsize, tile_budget):
    """Largest 128-multiple lane tile whose double-buffered in+out blocks
    (~4 * C * tile * itemsize bytes) fit the budget.  Prefers exact divisors
    of HW; for non-divisible HW the last tile is ragged (masked in the pool
    kernel, clipped on store)."""
    max_lanes = max(128, (tile_budget // (4 * C * itemsize)) // 128 * 128)
    if HW % 128 == 0:
        cands = [t for t in range(128, min(HW, max_lanes) + 1, 128) if HW % t == 0]
        return max(cands) if cands else 128
    return int(min(max_lanes, pl.cdiv(HW, 128) * 128))


def _make_fused_kernel(inv_hw):
    def kernel(x_ref, w1_ref, b1_ref, w2t_ref, b2c_ref, o_ref):
        xv = x_ref[0]                                             # (C, HW)
        # Squeeze: global average pool (cross-lane reduce, f32 accumulate).
        pooled = jnp.sum(xv.astype(jnp.float32), axis=1, keepdims=True) * inv_hw
        # Excitation: tiny FC -> ReLU -> FC -> sigmoid on VPU/XLU.
        h = jnp.sum(pooled * w1_ref[...], axis=0, keepdims=True) + b1_ref[...]
        h = jnp.maximum(h, 0.0)                                   # (1, hidden)
        s = jnp.sum(h * w2t_ref[...], axis=1, keepdims=True) + b2c_ref[...]
        gate = jax.nn.sigmoid(s)                                  # (C, 1)
        # Scale: lane-broadcast multiply, written back once.
        o_ref[0] = xv * gate.astype(o_ref.dtype)

    return kernel


def _make_pool_gate_kernel(inv_hw, t_hw, hw_total):
    ragged = (hw_total % t_hw) != 0

    def kernel(x_ref, w1_ref, b1_ref, w2t_ref, b2c_ref, gate_ref, sum_sc):
        t = pl.program_id(1)

        @pl.when(t == 0)
        def _():
            sum_sc[...] = jnp.zeros_like(sum_sc)

        xv = x_ref[0].astype(jnp.float32)                         # (C, t_hw)
        if ragged:
            lane = jax.lax.broadcasted_iota(jnp.int32, xv.shape, 1)
            xv = jnp.where(t * t_hw + lane < hw_total, xv, 0.0)
        sum_sc[...] += jnp.sum(xv, axis=1, keepdims=True)         # (C, 1)

        @pl.when(t == pl.num_programs(1) - 1)
        def _():
            pooled = sum_sc[...] * inv_hw                         # (C, 1)
            h = jnp.sum(pooled * w1_ref[...], axis=0, keepdims=True) + b1_ref[...]
            h = jnp.maximum(h, 0.0)                               # (1, hidden)
            s = jnp.sum(h * w2t_ref[...], axis=1, keepdims=True) + b2c_ref[...]
            gate_ref[0] = jax.nn.sigmoid(s)                       # (C, 1) f32

    return kernel


def _scale_kernel(x_ref, gate_ref, o_ref):
    # x block (1, C, t_hw) * gate block (1, C, 1): lane-broadcast multiply.
    o_ref[0] = x_ref[0] * gate_ref[0].astype(o_ref.dtype)


def se_layer(x_nchw, w1, b1, w2, b2, *, force_two_pass=False, hw_tile=None):
    """x_nchw: (B, C, H, W).  w1: (C, hidden), b1: (1, hidden),
    w2: (hidden, C), b2: (1, C).  Returns x * sigmoid(fc2(relu(fc1(gap(x)))))."""
    B, C, H, W = x_nchw.shape
    HW = H * W
    hidden = w1.shape[1]
    itemsize = jnp.dtype(x_nchw.dtype).itemsize
    vmem_limit, tile_budget = _vmem_config()

    x = x_nchw.reshape(B, C, HW)            # free reshape (contiguous NCHW)
    w2t = jnp.transpose(w2)                 # (C, hidden) — tiny, one time
    b2c = b2.reshape(C, 1)                  # (C, 1)
    inv_hw = 1.0 / HW

    weight_specs = [
        pl.BlockSpec((C, hidden), lambda *_: (0, 0)),   # w1
        pl.BlockSpec((1, hidden), lambda *_: (0, 0)),   # b1
        pl.BlockSpec((C, hidden), lambda *_: (0, 0)),   # w2t
        pl.BlockSpec((C, 1), lambda *_: (0, 0)),        # b2c
    ]

    # ---- preferred: fused single pass (read x once, write out once) ----
    fused_live = 4 * C * HW * itemsize      # ~2 in-buffers + 2 out-buffers
    if not force_two_pass and fused_live <= (vmem_limit * 3) // 4:
        out = pl.pallas_call(
            _make_fused_kernel(inv_hw),
            out_shape=jax.ShapeDtypeStruct((B, C, HW), x.dtype),
            grid_spec=pltpu.PrefetchScalarGridSpec(
                num_scalar_prefetch=0,
                grid=(B,),
                in_specs=[pl.BlockSpec((1, C, HW), lambda b: (b, 0, 0))]
                + weight_specs,
                out_specs=pl.BlockSpec((1, C, HW), lambda b: (b, 0, 0)),
            ),
            compiler_params=pltpu.CompilerParams(
                dimension_semantics=("parallel",),
                vmem_limit_bytes=vmem_limit),
        )(x, w1, b1, w2t, b2c)
        return out.reshape(B, C, H, W)

    # ---- fallback: two pipelined passes for large C*HW slabs ----
    t_hw = hw_tile if hw_tile is not None else _choose_hw_tile(
        HW, C, itemsize, tile_budget)
    n_hw = int(pl.cdiv(HW, t_hw))

    # pass 1: pooled gates (B, C, 1); pooling reduced across lane tiles
    gates = pl.pallas_call(
        _make_pool_gate_kernel(inv_hw, t_hw, HW),
        out_shape=jax.ShapeDtypeStruct((B, C, 1), jnp.float32),
        grid_spec=pltpu.PrefetchScalarGridSpec(
            num_scalar_prefetch=0,
            grid=(B, n_hw),
            in_specs=[pl.BlockSpec((1, C, t_hw), lambda b, t: (b, 0, t))]
            + weight_specs,
            out_specs=pl.BlockSpec((1, C, 1), lambda b, t: (b, 0, 0)),
            scratch_shapes=[pltpu.VMEM((C, 1), jnp.float32)],
        ),
        compiler_params=pltpu.CompilerParams(
            dimension_semantics=("parallel", "arbitrary"),
            vmem_limit_bytes=vmem_limit),
    )(x, w1, b1, w2t, b2c)

    # pass 2: pure scale, fully parallel grid, lane-dense output tiles
    out = pl.pallas_call(
        _scale_kernel,
        out_shape=jax.ShapeDtypeStruct((B, C, HW), x.dtype),
        grid_spec=pltpu.PrefetchScalarGridSpec(
            num_scalar_prefetch=0,
            grid=(B, n_hw),
            in_specs=[
                pl.BlockSpec((1, C, t_hw), lambda b, t: (b, 0, t)),
                pl.BlockSpec((1, C, 1), lambda b, t: (b, 0, 0)),
            ],
            out_specs=pl.BlockSpec((1, C, t_hw), lambda b, t: (b, 0, t)),
        ),
        compiler_params=pltpu.CompilerParams(
            dimension_semantics=("parallel", "parallel"),
            vmem_limit_bytes=vmem_limit),
    )(x, gates)

    return out.reshape(B, C, H, W)


def se_layer_ref(x_nchw, w1, b1, w2, b2):
    """Pure-JAX reference mirroring the PyTorch module (multiply=True)."""
    pooled = jnp.mean(x_nchw, axis=(2, 3))                  # (B, C)
    h = jnp.maximum(pooled @ w1 + b1, 0.0)                  # (B, hidden)
    y = jax.nn.sigmoid(h @ w2 + b2)                         # (B, C)
    return x_nchw * y[:, :, None, None]


if __name__ == "__main__":
    # channel >= reduction for a non-degenerate bottleneck (hidden = C // 64).
    B, C, H, W = 2, 128, 16, 16
    reduction = 64
    hidden = C // reduction  # = 2

    key = jax.random.PRNGKey(0)
    kx, k1, k2, k3, k4 = jax.random.split(key, 5)

    x = jax.random.normal(kx, (B, C, H, W), dtype=jnp.float32)
    # torch Linear stores (out, in); we keep the already-transposed (in, out)
    # layout so the math is pooled @ W1 and h @ W2.
    w1 = jax.random.normal(k1, (C, hidden), dtype=jnp.float32) * 0.1
    b1 = jax.random.normal(k2, (1, hidden), dtype=jnp.float32) * 0.1
    w2 = jax.random.normal(k3, (hidden, C), dtype=jnp.float32) * 0.1
    b2 = jax.random.normal(k4, (1, C), dtype=jnp.float32) * 0.1

    ref = se_layer_ref(x, w1, b1, w2, b2)

    # Fused single-pass path (the common case for these shapes).
    out_fused = jax.block_until_ready(se_layer(x, w1, b1, w2, b2))
    assert out_fused.shape == (B, C, H, W)
    assert jnp.allclose(out_fused, ref, atol=1e-4, rtol=1e-4), "fused mismatch"

    # Two-pass fallback (large-slab path), forced with a 128-lane tile so the
    # cross-tile pool accumulation is exercised.
    out_two = jax.block_until_ready(
        se_layer(x, w1, b1, w2, b2, force_two_pass=True, hw_tile=128))
    assert jnp.allclose(out_two, ref, atol=1e-4, rtol=1e-4), "two-pass mismatch"

    print("KERNEL_OK")
</pallas_src>

<mosaic_0001>
module attributes {stable_mosaic.version = 11 : i64} {
  func.func @kernel(%arg0: i32, %arg1: memref<1x128x256xf32, #tpu.memory_space<vmem>>, %arg2: memref<128x2xf32, #tpu.memory_space<vmem>>, %arg3: memref<1x2xf32, #tpu.memory_space<vmem>>, %arg4: memref<128x2xf32, #tpu.memory_space<vmem>>, %arg5: memref<128x1xf32, #tpu.memory_space<vmem>>, %arg6: memref<1x128x256xf32, #tpu.memory_space<vmem>>) attributes {dimension_semantics = [#tpu.dimension_semantics<parallel>], iteration_bounds = array<i64: 2>, scalar_prefetch = 0 : i64, scratch_operands = 0 : i64, tpu.core_type = #tpu.core_type<tc>, window_params = [{transform_indices = @transform_0, window_bounds = array<i64: 1, 128, 256>}, {pipeline_mode = #tpu.pipeline_mode<synchronous>, transform_indices = @transform_1, window_bounds = array<i64: 128, 2>}, {pipeline_mode = #tpu.pipeline_mode<synchronous>, transform_indices = @transform_2, window_bounds = array<i64: 1, 2>}, {pipeline_mode = #tpu.pipeline_mode<synchronous>, transform_indices = @transform_3, window_bounds = array<i64: 128, 2>}, {pipeline_mode = #tpu.pipeline_mode<synchronous>, transform_indices = @transform_4, window_bounds = array<i64: 128, 1>}, {transform_indices = @transform_5, window_bounds = array<i64: 1, 128, 256>}]} {
    %c0 = arith.constant 0 : index
    %c0_0 = arith.constant 0 : index
    %c0_1 = arith.constant 0 : index
    %0 = vector.load %arg1[%c0, %c0_0, %c0_1] : memref<1x128x256xf32, #tpu.memory_space<vmem>>, vector<1x128x256xf32>
    %1 = vector.shape_cast %0 : vector<1x128x256xf32> to vector<128x256xf32>
    %cst = arith.constant dense<0.000000e+00> : vector<128xf32>
    %2 = vector.multi_reduction <add>, %1, %cst [1] : vector<128x256xf32> to vector<128xf32>
    %3 = vector.shape_cast %2 : vector<128xf32> to vector<128x1xf32>
    %cst_2 = arith.constant 3.906250e-03 : f32
    %4 = vector.broadcast %cst_2 : f32 to vector<128x1xf32>
    %5 = arith.mulf %3, %4 : vector<128x1xf32>
    %c0_3 = arith.constant 0 : index
    %c0_4 = arith.constant 0 : index
    %6 = vector.load %arg2[%c0_3, %c0_4] : memref<128x2xf32, #tpu.memory_space<vmem>>, vector<128x2xf32>
    %7 = vector.broadcast %5 : vector<128x1xf32> to vector<128x2xf32>
    %8 = arith.mulf %7, %6 : vector<128x2xf32>
    %cst_5 = arith.constant dense<0.000000e+00> : vector<2xf32>
    %9 = vector.multi_reduction <add>, %8, %cst_5 [0] : vector<128x2xf32> to vector<2xf32>
    %10 = vector.shape_cast %9 : vector<2xf32> to vector<1x2xf32>
    %c0_6 = arith.constant 0 : index
    %c0_7 = arith.constant 0 : index
    %11 = vector.load %arg3[%c0_6, %c0_7] : memref<1x2xf32, #tpu.memory_space<vmem>>, vector<1x2xf32>
    %12 = arith.addf %10, %11 : vector<1x2xf32>
    %cst_8 = arith.constant 0.000000e+00 : f32
    %13 = vector.broadcast %cst_8 : f32 to vector<1x2xf32>
    %14 = arith.maximumf %12, %13 : vector<1x2xf32>
    %c0_9 = arith.constant 0 : index
    %c0_10 = arith.constant 0 : index
    %15 = vector.load %arg4[%c0_9, %c0_10] : memref<128x2xf32, #tpu.memory_space<vmem>>, vector<128x2xf32>
    %16 = vector.broadcast %14 : vector<1x2xf32> to vector<128x2xf32>
    %17 = arith.mulf %16, %15 : vector<128x2xf32>
    %cst_11 = arith.constant dense<0.000000e+00> : vector<128xf32>
    %18 = vector.multi_reduction <add>, %17, %cst_11 [1] : vector<128x2xf32> to vector<128xf32>
    %19 = vector.shape_cast %18 : vector<128xf32> to vector<128x1xf32>
    %c0_12 = arith.constant 0 : index
    %c0_13 = arith.constant 0 : index
    %20 = vector.load %arg5[%c0_12, %c0_13] : memref<128x1xf32, #tpu.memory_space<vmem>>, vector<128x1xf32>
    %21 = arith.addf %19, %20 : vector<128x1xf32>
    %22 = arith.negf %21 : vector<128x1xf32>
    %23 = math.exp %22 : vector<128x1xf32>
    %cst_14 = arith.constant 1.000000e+00 : f32
    %24 = vector.broadcast %cst_14 : f32 to vector<128x1xf32>
    %25 = arith.addf %24, %23 : vector<128x1xf32>
    %26 = arith.divf %24, %25 : vector<128x1xf32>
    %27 = vector.broadcast %26 : vector<128x1xf32> to vector<128x256xf32>
    %28 = arith.mulf %1, %27 : vector<128x256xf32>
    %c0_15 = arith.constant 0 : index
    %c0_16 = arith.constant 0 : index
    %c0_17 = arith.constant 0 : index
    %29 = vector.load %arg6[%c0_15, %c0_16, %c0_17] : memref<1x128x256xf32, #tpu.memory_space<vmem>>, vector<1x128x256xf32>
    %30 = vector.shape_cast %29 : vector<1x128x256xf32> to vector<128x256xf32>
    %31 = vector.shape_cast %28 : vector<128x256xf32> to vector<1x128x256xf32>
    tpu.vector_store %arg6[%c0_15, %c0_16, %c0_17], %31 {strides = array<i32>} : memref<1x128x256xf32, #tpu.memory_space<vmem>>, vector<1x128x256xf32>,
    return
  }
  func.func @transform_0(%arg0: i32) -> (i32, i32, i32) {
    %c0_i32 = arith.constant 0 : i32
    %c0_i32_0 = arith.constant 0 : i32
    %c0_i32_1 = arith.constant 0 : i32
    return %arg0, %c0_i32, %c0_i32_0 : i32, i32, i32
  }
  func.func @transform_1(%arg0: i32) -> (i32, i32) {
    %c0_i32 = arith.constant 0 : i32
    %c0_i32_0 = arith.constant 0 : i32
    %c0_i32_1 = arith.constant 0 : i32
    return %c0_i32, %c0_i32_0 : i32, i32
  }
  func.func @transform_2(%arg0: i32) -> (i32, i32) {
    %c0_i32 = arith.constant 0 : i32
    %c0_i32_0 = arith.constant 0 : i32
    %c0_i32_1 = arith.constant 0 : i32
    return %c0_i32, %c0_i32_0 : i32, i32
  }
  func.func @transform_3(%arg0: i32) -> (i32, i32) {
    %c0_i32 = arith.constant 0 : i32
    %c0_i32_0 = arith.constant 0 : i32
    %c0_i32_1 = arith.constant 0 : i32
    return %c0_i32, %c0_i32_0 : i32, i32
  }
  func.func @transform_4(%arg0: i32) -> (i32, i32) {
    %c0_i32 = arith.constant 0 : i32
    %c0_i32_0 = arith.constant 0 : i32
    %c0_i32_1 = arith.constant 0 : i32
    return %c0_i32, %c0_i32_0 : i32, i32
  }
  func.func @transform_5(%arg0: i32) -> (i32, i32, i32) {
    %c0_i32 = arith.constant 0 : i32
    %c0_i32_0 = arith.constant 0 : i32
    %c0_i32_1 = arith.constant 0 : i32
    return %arg0, %c0_i32, %c0_i32_0 : i32, i32, i32
  }
}

</mosaic_0001>

<bundles_post_ra>
// kernel: tpu_custom_call.1
= control target key start
LH: loop header
LB: loop body
LE: loop exit
PB: predicated region body
PF: predicated region fallthrough
CT: control target
= control target key end

     0   :  { %10 = vsyncpa [#allocation3], 0  ;;  %s2093_s0 = inlined_call_operand.hbm [shape: f32[2,128,256], index: 0, kind: input, shape index: {}]   ;;  %s2094_s1 = inlined_call_operand.vmem [shape: f32[128,2], index: 1, kind: input, shape index: {}]   ;;  %s2095_s2 = inlined_call_operand.vmem [shape: f32[1,2], index: 2, kind: input, shape index: {}]   ;;  %s2096_s3 = inlined_call_operand.vmem [shape: f32[128,2], index: 3, kind: input, shape index: {}]   ;;  %s2097_s4 = inlined_call_operand.vmem [shape: f32[128,1], index: 4, kind: input, shape index: {}]   ;;  %s2098_s5 = inlined_call_operand.hbm [shape: f32[2,128,256], index: 5, kind: output, shape index: {}]  }
   0x1   :  { %12 = vsyncpa [#allocation3 + $0x1], 0 }
   0x2   :  { %13 = vsyncpa [#allocation4], 0 }
   0x3   :  { %15 = vsyncpa [#allocation4 + $0x1], 0  ;;  %s1379_s18 = smov 0   ;;  %s1381_s19 = smov 0  }
   0x4   :  { %s1383_s20 = smov 0   ;;  %s1385_s21 = smov 0  }
   0x5 LB: > { %s1400_s22 = sadd.s32 4294967295, %s1342_s21   ;;  %s1064_s23 = sadd.s32 4294967294, %s1342_s21   ;;  %s1342_s21 = sphi %s1385_s21, %s2122_s21   ;;  %s1338_s20 = sphi %s1383_s20, %s2121_s20   ;;  %s1334_s19 = sphi %s1381_s19, %s2120_s19   ;;  %s1330_s18 = sphi %s1379_s18, %s2119_s18  }
   0x6   : > { %s1404_s24 = sadd.s32 1, %s1342_s21   ;;  %s28_s25 = sadd.s32 1, %s1338_s20 }
   0x7   : > { %s25_s26 = ssub.s32 %s1342_s21, %s1404_s24  ;;  %p35_p0 = scmp.ne.s32.totalorder %s1338_s20, %s1334_s19 }
   0x8   : > { %p26_p1 = scmp.eq.s32.totalorder %s25_s26, 0  ;;  %p36_p2 = scmp.eq.s32.totalorder %s1342_s21, 0 }
   0x9   : > { %p41_p3 = scmp.ne.s32.totalorder %s1334_s19, %s1330_s18  ;;  %p42_p4 = scmp.eq.s32.totalorder %s1400_s22, 0 }
   0xa   : > { %s1416_s27 = scalar_select %p26_p1, %s1338_s20, %s28_s25  }
   0xb   : > { %p1418_p5 = por %p36_p2, %p35_p0  ;;  %p1422_p6 = por %p42_p4, %p41_p3 }
   0xc   : > { %p149_p7 = scmp.eq.s32.totalorder %s1400_s22, 1  ;;  %p155_p8 = scmp.eq.s32.totalorder %s1064_s23, 1 }
   0xd   : > { %p1108_p10 = scmp.lt.s32.totalorder %s1342_s21, 2  ;;  %s187_s7 = sand.u32 1, %s1338_s20  }
   0xe   : > { %p1429_p11 = por %p149_p7, %p35_p0  ;;  %p1433_p12 = por %p155_p8, %p41_p3 }
   0xf   : > { %s1094_s8 = sshll.u32 %s1342_s21, 8  ;;  %s1067_s9 = sshll.u32 %s187_s7, 8 }
  0x10   : > { %s196_s12 = scalar_lea.hbm %s2093_s0, %s1094_s8  ;;  %s191_s14 = scalar_lea.vmem [#allocation2], %s1067_s9 }
  0x11   : > { %s197_s13 = sshll.u32 %s196_s12, 4  ;;  %s199_s15 = sshll.u32 %s191_s14, 4  ;;  %s198_s13 = int_to_ptr.hbm [resolvable:$true] %s197_s13  ;;  %s200_s15 = int_to_ptr.vmem [resolvable:$true] %s199_s15 }
  0x12   : > { %p1444_p13 = pnand %p1108_p10, %p1418_p5  ;;  %p1070_p0 = scmp.ge.s32.totalorder %s1342_s21, 1 }
  0x13   : > { %p207_p1 = scmp.lt.s32.totalorder %s1342_s21, 3  ;;  %s188_s17 = scalar_lea.sflag [#allocation3], %s187_s7 }
  0x14   : > { %s1246_s23 = sshra.s32 %s198_s13, 4  ;;  %p1250_p3 = pneg %p1444_p13  ;;  %s1247_s23 = int_to_ptr.hbm [resolvable:$true] %s1246_s23 }
  0x15   : > { %s1248_s25 = scalar_lea.hbm %s1247_s23, 256  ;;  %s1253_s28 = scalar_lea.hbm %s2093_s0, 512 }
  0x16   : > { %p1249_p2 = scmp.ne.s32.totalorder %s1247_s23, %s1248_s25  ;;  %p1254_p5 = scmp.lt.s32.totalorder %s1247_s23, %s2093_s0 }
  0x17   : > { %p1255_p8 = scmp.lt.s32.totalorder %s1253_s28, %s1248_s25 }
  0x18   : > { %p1251_p4 = pnand %p1250_p3, %p1249_p2 }
  0x19   : > { %p1256_p10 = por %p1255_p8, %p1254_p5 }
  0x1a   : > { %p1252_p7 = pneg %p1251_p4 }
  0x1c   : > { %p1257_p9 = pnand %p1256_p10, %p1252_p7 }
  0x1e   : > { %1260 = shalt.err (!%p1257_p9)
}
  0x1f   : > { %s1344_s7 = smov 256   ;;  %s1345_s11 = smov 16  }
  0x20   : > { %1103 = dma.hbm_to_vmem [thread:$0]  (!%p1444_p13), %s198_s13, 4096, %s200_s15, %s188_s17, %s1344_s7, %s1344_s7, %s1345_s11  }
  0x21   : > { %p208_p2 = pnand %p1070_p0, %p207_p1 }
  0x22   : > { %s1465_s12 = sand.u32 (!%p208_p2), 1, %s1334_s19  }
  0x23   : > { %211 = sbr.rel (%p208_p2) target bundleno = 537 (0x219), region = 40  ;;  %s1071_s14 = sshll.u32 (!%p208_p2), %s1465_s12, 8 }
  0x24   : > { %s214_s23 = scalar_lea.sflag (!%p208_p2), [#allocation3], %s1465_s12  ;;  %s1471_s25 = scalar_lea.vmem (!%p208_p2), [#allocation2], %s1071_s14 }
  0x28   : > { %1321 = dma.done.wait (%p1422_p6), %s214_s23, 4096  }
  0x29   : > { %1323 = vsyncadd (%p1422_p6), %s214_s23, 4294963200  ;;  %v245_v0 = vld [vmem:[%s1471_s25] sm:$0xff]  ;;  %v246_v1 = vld [vmem:[%s1471_s25 + $0x8] sm:$0xff]  ;;  %vm373_vm0 = vcmask 15360   ;;  %s1995_s28 = scalar_lea.vmem [#allocation5], %s1071_s14  ;;  %s1095_s14 = sshll.u32 %s1400_s22, 8 }
  0x2a   : > { %v249_v2 = vld [vmem:[%s1471_s25 + $0x20] sm:$0xff]  ;;  %v277_v3 = vadd.f32 %v246_v1, %v245_v0  ;;  %v250_v4 = vld [vmem:[%s1471_s25 + $0x28] sm:$0xff]  ;;  %v247_v9 = vld [vmem:[%s1471_s25 + $0x10] sm:$0xff]  ;;  %s987_s7 = scalar_lea.hbm %s2098_s5, %s1095_s14  ;;  %s988_s22 = sshll.u32 %s1995_s28, 4  ;;  %s989_s22 = int_to_ptr.vmem [resolvable:$true] %s988_s22 }
  0x2b   : > { %v253_v5 = vld [vmem:[%s1471_s25 + $0x40] sm:$0xff]  ;;  %v254_v6 = vld [vmem:[%s1471_s25 + $0x48] sm:$0xff]  ;;  %v283_v7 = vadd.f32 %v250_v4, %v249_v2  ;;  %v248_v10 = vld [vmem:[%s1471_s25 + $0x18] sm:$0xff]  ;;  %s990_s11 = sshll.u32 %s987_s7, 4  ;;  %s976_s23 = scalar_lea.sflag [#allocation4], %s1465_s12  ;;  %s991_s11 = int_to_ptr.hbm [resolvable:$true] %s990_s11 }
  0x2c   : > { %v289_v8 = vadd.f32 %v254_v6, %v253_v5  ;;  %278 = vadd.xlane.f32.xlu0 %v277_v3  ;;  %v251_v11 = vld [vmem:[%s1471_s25 + $0x30] sm:$0xff]  ;;  %v252_v12 = vld [vmem:[%s1471_s25 + $0x38] sm:$0xff]  ;;  %v280_v15 = vadd.f32 %v248_v10, %v247_v9  ;;  %v257_v18 = vld [vmem:[%s1471_s25 + $0x60] sm:$0xff]  ;;  %s1290_s29 = sshra.s32 %s991_s11, 4  ;;  %s1296_s17 = scalar_lea.hbm %s2098_s5, 512  ;;  %s1291_s29 = int_to_ptr.hbm [resolvable:$true] %s1290_s29 }
  0x2d   : > { %284 = vadd.xlane.f32.xlu1 %v283_v7  ;;  %v255_v13 = vld [vmem:[%s1471_s25 + $0x50] sm:$0xff]  ;;  %v256_v14 = vld [vmem:[%s1471_s25 + $0x58] sm:$0xff]  ;;  %v286_v16 = vadd.f32 %v252_v12, %v251_v11  ;;  %v258_v19 = vld [vmem:[%s1471_s25 + $0x68] sm:$0xff]  ;;  %s1292_s13 = scalar_lea.hbm %s1291_s29, 256  ;;  %p1297_p0 = scmp.lt.s32.totalorder %s1291_s29, %s2098_s5 }
  0x2e   : > { %290 = vadd.xlane.f32.xlu2 %v289_v8  ;;  %v292_v17 = vadd.f32 %v256_v14, %v255_v13  ;;  %v259_v20 = vld [vmem:[%s1471_s25 + $0x70] sm:$0xff]  ;;  %v260_v21 = vld [vmem:[%s1471_s25 + $0x78] sm:$0xff]  ;;  %v261_v22 = vld [vmem:[%s1471_s25 + $0x80] sm:$0xff]  ;;  %v295_v24 = vadd.f32 %v258_v19, %v257_v18  ;;  %p1293_p6 = scmp.ne.s32.totalorder %s1291_s29, %s1292_s13  ;;  %p1298_p1 = scmp.lt.s32.totalorder %s1296_s17, %s1292_s13 }
  0x2f   : > { %v262_v23 = vld [vmem:[%s1471_s25 + $0x88] sm:$0xff]  ;;  %v298_v25 = vadd.f32 %v260_v21, %v259_v20  ;;  %v263_v27 = vld [vmem:[%s1471_s25 + $0x90] sm:$0xff]  ;;  %v264_v28 = vld [vmem:[%s1471_s25 + $0x98] sm:$0xff] }
  0x30   : > { %v301_v26 = vadd.f32 %v262_v23, %v261_v22  ;;  %v265_v29 = vld [vmem:[%s1471_s25 + $0xa0] sm:$0xff]  ;;  %v266_v30 = vld [vmem:[%s1471_s25 + $0xa8] sm:$0xff]  ;;  %v267_v31 = vld [vmem:[%s1471_s25 + $0xb0] sm:$0xff]  ;;  %v304_v33 = vadd.f32 %v264_v28, %v263_v27  ;;  %p1294_p9 = pnand %p1293_p6, %p1429_p11  ;;  %p1299_p3 = por %p1298_p1, %p1297_p0 }
  0x31   : > { %v268_v32 = vld [vmem:[%s1471_s25 + $0xb8] sm:$0xff]  ;;  %v307_v34 = vadd.f32 %v266_v30, %v265_v29  ;;  %v269_v36 = vld [vmem:[%s1471_s25 + $0xc0] sm:$0xff]  ;;  %v270_v37 = vld [vmem:[%s1471_s25 + $0xc8] sm:$0xff] }
  0x32   : > { %v310_v35 = vadd.f32 %v268_v32, %v267_v31  ;;  %v271_v38 = vld [vmem:[%s1471_s25 + $0xd0] sm:$0xff]  ;;  %v272_v39 = vld [vmem:[%s1471_s25 + $0xd8] sm:$0xff]  ;;  %v273_v40 = vld [vmem:[%s1471_s25 + $0xe0] sm:$0xff]  ;;  %v313_v42 = vadd.f32 %v270_v37, %v269_v36  ;;  %p1295_p13 = pneg %p1294_p9 }
  0x33   : > { %v274_v41 = vld [vmem:[%s1471_s25 + $0xe8] sm:$0xff]  ;;  %v316_v43 = vadd.f32 %v272_v39, %v271_v38  ;;  %v275_v45 = vld [vmem:[%s1471_s25 + $0xf0] sm:$0xff]  ;;  %v276_v46 = vld [vmem:[%s1471_s25 + $0xf8] sm:$0xff] }
  0x34   : > { %281 = vadd.xlane.f32.xlu0 %v280_v15  ;;  %v319_v44 = vadd.f32 %v274_v41, %v273_v40  ;;  %v322_v47 = vadd.f32 %v276_v46, %v275_v45  ;;  %v341_v52 = vld [vmem:[%s2094_s1] sm:$0xff]  ;;  %v343_v54 = vld [vmem:[%s2094_s1 + $0x10] sm:$0xff]  ;;  %v342_v55 = vld [vmem:[%s2094_s1 + $0x8] sm:$0xff]  ;;  %p1300_p4 = pnand %p1299_p3, %p1295_p13 }
  0x35   : > { %287 = vadd.xlane.f32.xlu1 %v286_v16  ;;  %v344_v59 = vld [vmem:[%s2094_s1 + $0x18] sm:$0xff]  ;;  %v345_v2 = vld [vmem:[%s2094_s1 + $0x20] sm:$0xff]  ;;  %v346_v8 = vld [vmem:[%s2094_s1 + $0x28] sm:$0xff] }
  0x36   : > { %293 = vadd.xlane.f32.xlu2 %v292_v17  ;;  %v347_v13 = vld [vmem:[%s2094_s1 + $0x30] sm:$0xff]  ;;  %v348_v17 = vld [vmem:[%s2094_s1 + $0x38] sm:$0xff]  ;;  %v349_v22 = vld [vmem:[%s2094_s1 + $0x40] sm:$0xff] }
  0x37   : > { %v351_v38 = vld [vmem:[%s2094_s1 + $0x50] sm:$0xff] }
  0x3c   : > { %296 = vadd.xlane.f32.xlu0 %v295_v24 }
  0x3d   : > { %299 = vadd.xlane.f32.xlu1 %v298_v25 }
  0x3e   : > { %302 = vadd.xlane.f32.xlu2 %v301_v26 }
  0x44   : > { %305 = vadd.xlane.f32.xlu0 %v304_v33 }
  0x45   : > { %308 = vadd.xlane.f32.xlu1 %v307_v34  ;;  %v350_v34 = vld [vmem:[%s2094_s1 + $0x48] sm:$0xff] }
  0x46   : > { %311 = vadd.xlane.f32.xlu2 %v310_v35 }
  0x4c   : > { %314 = vadd.xlane.f32.xlu0 %v313_v42 }
  0x4d   : > { %317 = vadd.xlane.f32.xlu1 %v316_v43  ;;  %v352_v43 = vld [vmem:[%s2094_s1 + $0x58] sm:$0xff] }
  0x4e   : > { %320 = vadd.xlane.f32.xlu2 %v319_v44 }
  0x54   : > { %323 = vadd.xlane.f32.xlu0 %v322_v47 }
  0x9f   : > { %v279_v48 = vpop.xlane.xlu0 %278 }
  0xa0   : > { %v285_v49 = vpop.xlane.xlu1 %284  ;;  %v325_v51 = vmul.f32 0.00390625, %v279_v48 }
  0xa1   : > { %v291_v50 = vpop.xlane.xlu2 %290  ;;  %v327_v53 = vmul.f32 0.00390625, %v285_v49 }
  0xa2   : > { %v357_v57 = vmul.f32 %v341_v52, %v325_v51  ;;  %v329_v0 = vmul.f32 0.00390625, %v291_v50 }
  0xa3   : > { %v359_v63 = vmul.f32 %v343_v54, %v327_v53  ;;  %v353_v53 = vld [vmem:[%s2094_s1 + $0x60] sm:$0xff] }
  0xa4   : > { %v374_v4 = vsel %vm373_vm0, %v357_v57, 0.0  ;;  %v361_v10 = vmul.f32 %v345_v2, %v329_v0  ;;  %v354_v57 = vld [vmem:[%s2094_s1 + $0x68] sm:$0xff] }
  0xa5   : > { %v377_v9 = vsel %vm373_vm0, %v359_v63, 0.0 }
  0xa6   : > { %v381_v24 = vsel %vm373_vm0, %v361_v10, 0.0 }
  0xa7   : > { %v282_v56 = vpop.xlane.xlu0 %281 }
  0xa8   : > { %v326_v58 = vmul.f32 0.00390625, %v282_v56  ;;  %v288_v60 = vpop.xlane.xlu1 %287 }
  0xa9   : > { %v294_v61 = vpop.xlane.xlu2 %293  ;;  %v328_v62 = vmul.f32 0.00390625, %v288_v60 }
  0xaa   : > { %v358_v1 = vmul.f32 %v342_v55, %v326_v58  ;;  %v330_v6 = vmul.f32 0.00390625, %v294_v61  ;;  %v355_v61 = vld [vmem:[%s2094_s1 + $0x70] sm:$0xff] }
  0xab   : > { %v360_v3 = vmul.f32 %v344_v59, %v328_v62 }
  0xac   : > { %v375_v5 = vsel %vm373_vm0, %v358_v1, 0.0  ;;  %v362_v15 = vmul.f32 %v346_v8, %v330_v6 }
  0xad   : > { %v376_v7 = vadd.f32 %v375_v5, %v374_v4  ;;  %v379_v11 = vsel %vm373_vm0, %v360_v3, 0.0 }
  0xae   : > { %v383_v28 = vsel %vm373_vm0, %v362_v15, 0.0 }
  0xaf   : > { %v378_v12 = vadd.f32 %v377_v9, %v376_v7  ;;  %v297_v14 = vpop.xlane.xlu0 %296  ;;  %v356_v7 = vld [vmem:[%s2094_s1 + $0x78] sm:$0xff] }
  0xb0   : > { %v331_v16 = vmul.f32 0.00390625, %v297_v14  ;;  %v300_v18 = vpop.xlane.xlu1 %299 }
  0xb1   : > { %v303_v19 = vpop.xlane.xlu2 %302  ;;  %v380_v20 = vadd.f32 %v379_v11, %v378_v12  ;;  %v332_v21 = vmul.f32 0.00390625, %v300_v18 }
  0xb2   : > { %v333_v23 = vmul.f32 0.00390625, %v303_v19  ;;  %v363_v25 = vmul.f32 %v347_v13, %v331_v16 }
  0xb3   : > { %v382_v26 = vadd.f32 %v381_v24, %v380_v20  ;;  %v364_v27 = vmul.f32 %v348_v17, %v332_v21  ;;  %v411_v20 = vld [vmem:[%s2095_s2] sm:$0x1]  ;;  %v416_v24 = vld [vmem:[%s2096_s3 + $0x10] sm:$0xff] }
  0xb4   : > { %v365_v29 = vmul.f32 %v349_v22, %v333_v23  ;;  %v385_v31 = vsel %vm373_vm0, %v363_v25, 0.0  ;;  %v415_v25 = vld [vmem:[%s2096_s3 + $0x8] sm:$0xff] }
  0xb5   : > { %v384_v30 = vadd.f32 %v383_v28, %v382_v26  ;;  %v387_v32 = vsel %vm373_vm0, %v364_v27, 0.0  ;;  %v414_v26 = vld [vmem:[%s2096_s3] sm:$0xff] }
  0xb6   : > { %v389_v36 = vsel %vm373_vm0, %v365_v29, 0.0 }
  0xb7   : > { %v386_v33 = vadd.f32 %v385_v31, %v384_v30  ;;  %v306_v35 = vpop.xlane.xlu0 %305 }
  0xb8   : > { %v334_v37 = vmul.f32 0.00390625, %v306_v35  ;;  %v309_v39 = vpop.xlane.xlu1 %308  ;;  %v418_v35 = vld [vmem:[%s2096_s3 + $0x20] sm:$0xff] }
  0xb9   : > { %v312_v40 = vpop.xlane.xlu2 %311  ;;  %v388_v41 = vadd.f32 %v387_v32, %v386_v33  ;;  %v335_v42 = vmul.f32 0.00390625, %v309_v39 }
  0xba   : > { %v336_v44 = vmul.f32 0.00390625, %v312_v40  ;;  %v366_v45 = vmul.f32 %v350_v34, %v334_v37  ;;  %v419_v34 = vld [vmem:[%s2096_s3 + $0x28] sm:$0xff] }
  0xbb   : > { %v390_v46 = vadd.f32 %v389_v36, %v388_v41  ;;  %v367_v47 = vmul.f32 %v351_v38, %v335_v42  ;;  %v417_v36 = vld [vmem:[%s2096_s3 + $0x18] sm:$0xff] }
  0xbc   : > { %v391_v48 = vsel %vm373_vm0, %v366_v45, 0.0  ;;  %v368_v49 = vmul.f32 %v352_v43, %v336_v44  ;;  %v422_v43 = vld [vmem:[%s2096_s3 + $0x40] sm:$0xff]  ;;  %v421_v44 = vld [vmem:[%s2096_s3 + $0x38] sm:$0xff]  ;;  %v420_v45 = vld [vmem:[%s2096_s3 + $0x30] sm:$0xff] }
  0xbd   : > { %v392_v50 = vadd.f32 %v391_v48, %v390_v46  ;;  %v393_v51 = vsel %vm373_vm0, %v367_v47, 0.0 }
  0xbe   : > { %v395_v55 = vsel %vm373_vm0, %v368_v49, 0.0 }
  0xbf   : > { %v394_v52 = vadd.f32 %v393_v51, %v392_v50  ;;  %v315_v54 = vpop.xlane.xlu0 %314 }
  0xc0   : > { %v337_v56 = vmul.f32 0.00390625, %v315_v54  ;;  %v318_v58 = vpop.xlane.xlu1 %317  ;;  %v423_v54 = vld [vmem:[%s2096_s3 + $0x48] sm:$0xff] }
  0xc1   : > { %v321_v59 = vpop.xlane.xlu2 %320  ;;  %v338_v60 = vmul.f32 0.00390625, %v318_v58  ;;  %v396_v0 = vadd.f32 %v395_v55, %v394_v52  ;;  %v425_v52 = vld [vmem:[%s2096_s3 + $0x58] sm:$0xff] }
  0xc2   : > { %v339_v62 = vmul.f32 0.00390625, %v321_v59  ;;  %v369_v63 = vmul.f32 %v353_v53, %v337_v56  ;;  %v424_v53 = vld [vmem:[%s2096_s3 + $0x50] sm:$0xff] }
  0xc3   : > { %v370_v1 = vmul.f32 %v354_v57, %v338_v60 }
  0xc4   : > { %v397_v2 = vsel %vm373_vm0, %v369_v63, 0.0  ;;  %v371_v3 = vmul.f32 %v355_v61, %v339_v62  ;;  %v428_v61 = vld [vmem:[%s2096_s3 + $0x70] sm:$0xff]  ;;  %v427_v62 = vld [vmem:[%s2096_s3 + $0x68] sm:$0xff]  ;;  %v426_v63 = vld [vmem:[%s2096_s3 + $0x60] sm:$0xff] }
  0xc5   : > { %v398_v4 = vadd.f32 %v397_v2, %v396_v0  ;;  %v399_v5 = vsel %vm373_vm0, %v370_v1, 0.0 }
  0xc6   : > { %v401_v9 = vsel %vm373_vm0, %v371_v3, 0.0 }
  0xc7   : > { %v400_v6 = vadd.f32 %v399_v5, %v398_v4  ;;  %v324_v8 = vpop.xlane.xlu0 %323 }
  0xc8   : > { %v340_v10 = vmul.f32 0.00390625, %v324_v8 }
  0xc9   : > { %v402_v12 = vadd.f32 %v401_v9, %v400_v6  ;;  %v429_v6 = vld [vmem:[%s2096_s3 + $0x78] sm:$0xff]  ;;  %v497_v9 = vld [vmem:[%s2097_s4 + $0x10] sm:$0xff] }
  0xca   : > { %v372_v11 = vmul.f32 %v356_v7, %v340_v10  ;;  %v496_v10 = vld [vmem:[%s2097_s4 + $0x8] sm:$0xff] }
  0xcc   : > { %v403_v13 = vsel %vm373_vm0, %v372_v11, 0.0  ;;  %v495_v11 = vld [vmem:[%s2097_s4] sm:$0xff] }
  0xcd   : > { %v404_v14 = vadd.f32 %v403_v13, %v402_v12 }
  0xcf   : > { %v405_v15 = vrot.slane %v404_v14, 4 }
  0xd1   : > { %v406_v16 = vadd.f32 %v405_v15, %v404_v14 }
  0xd3   : > { %v407_v17 = vrot.slane %v406_v16, 2 }
  0xd5   : > { %v408_v18 = vadd.f32 %v407_v17, %v406_v16 }
  0xd7   : > { %v409_v19 = vrot.slane %v408_v18, 1 }
  0xd9   : > { %v410_v21 = vadd.f32 %v409_v19, %v408_v18 }
  0xdb   : > { %v412_v22 = vadd.f32 %v411_v20, %v410_v21  ;;  %v1346_v20 = vmov 0  }
  0xdc   : > { %1149 = vset.pattern.permute.xlu1 %v1346_v20  ;;  %1148 = vset.pattern.permute.xlu0 %v1346_v20 }
  0xdd   : > { %v413_v23 = vmax.f32 %v412_v22, 0.0  ;;  %1147 = vset.pattern.permute.xlu2 %v1346_v20  ;;  %v500_v22 = vld [vmem:[%s2097_s4 + $0x28] sm:$0xff] }
  0xdf   : > { %v430_v27 = vperm.slane %v413_v23, 0  ;;  %v499_v23 = vld [vmem:[%s2097_s4 + $0x20] sm:$0xff] }
  0xe1   : > { %v433_v28 = vmul.f32 %v430_v27, %v416_v24  ;;  %v432_v29 = vmul.f32 %v430_v27, %v415_v25  ;;  %v431_v30 = vmul.f32 %v430_v27, %v414_v26  ;;  %v436_v37 = vmul.f32 %v430_v27, %v419_v34  ;;  %v498_v24 = vld [vmem:[%s2097_s4 + $0x18] sm:$0xff] }
  0xe2   : > { %v435_v38 = vmul.f32 %v430_v27, %v418_v35  ;;  %v434_v39 = vmul.f32 %v430_v27, %v417_v36  ;;  %v439_v46 = vmul.f32 %v430_v27, %v422_v43  ;;  %v438_v47 = vmul.f32 %v430_v27, %v421_v44 }
  0xe3   : > { %v453_v31 = vsel %vm373_vm0, %v433_v28, 0.0  ;;  %v450_v32 = vsel %vm373_vm0, %v432_v29, 0.0  ;;  %v447_v33 = vsel %vm373_vm0, %v431_v30, 0.0  ;;  %v462_v40 = vsel %vm373_vm0, %v436_v37, 0.0 }
  0xe4   : > { %454 = vadd.xlane.f32.xlu0 %v453_v31  ;;  %451 = vadd.xlane.f32.xlu2 %v450_v32  ;;  %v459_v41 = vsel %vm373_vm0, %v435_v38, 0.0  ;;  %v456_v42 = vsel %vm373_vm0, %v434_v39, 0.0  ;;  %v437_v48 = vmul.f32 %v430_v27, %v420_v45  ;;  %v471_v49 = vsel %vm373_vm0, %v439_v46, 0.0 }
  0xe5   : > { %448 = vadd.xlane.f32.xlu1 %v447_v33  ;;  %v468_v50 = vsel %vm373_vm0, %v438_v47, 0.0  ;;  %v442_v55 = vmul.f32 %v430_v27, %v425_v52  ;;  %v441_v56 = vmul.f32 %v430_v27, %v424_v53  ;;  %v440_v57 = vmul.f32 %v430_v27, %v423_v54 }
  0xe6   : > { %v465_v51 = vsel %vm373_vm0, %v437_v48, 0.0  ;;  %v445_v0 = vmul.f32 %v430_v27, %v428_v61  ;;  %v444_v1 = vmul.f32 %v430_v27, %v427_v62  ;;  %v443_v2 = vmul.f32 %v430_v27, %v426_v63 }
  0xe7   : > { %v480_v58 = vsel %vm373_vm0, %v442_v55, 0.0  ;;  %v477_v59 = vsel %vm373_vm0, %v441_v56, 0.0  ;;  %v474_v60 = vsel %vm373_vm0, %v440_v57, 0.0  ;;  %v446_v7 = vmul.f32 %v430_v27, %v429_v6 }
  0xe8   : > { %v489_v3 = vsel %vm373_vm0, %v445_v0, 0.0  ;;  %v486_v4 = vsel %vm373_vm0, %v444_v1, 0.0  ;;  %v483_v5 = vsel %vm373_vm0, %v443_v2, 0.0  ;;  %v506_v2 = vld [vmem:[%s2097_s4 + $0x58] sm:$0xff] }
  0xe9   : > { %v492_v8 = vsel %vm373_vm0, %v446_v7, 0.0 }
  0xec   : > { %463 = vadd.xlane.f32.xlu0 %v462_v40  ;;  %460 = vadd.xlane.f32.xlu2 %v459_v41  ;;  %v503_v40 = vld [vmem:[%s2097_s4 + $0x40] sm:$0xff]  ;;  %v502_v41 = vld [vmem:[%s2097_s4 + $0x38] sm:$0xff] }
  0xed   : > { %457 = vadd.xlane.f32.xlu1 %v456_v42  ;;  %v501_v42 = vld [vmem:[%s2097_s4 + $0x30] sm:$0xff] }
  0xf4   : > { %472 = vadd.xlane.f32.xlu0 %v471_v49  ;;  %469 = vadd.xlane.f32.xlu2 %v468_v50 }
  0xf5   : > { %466 = vadd.xlane.f32.xlu1 %v465_v51 }
  0xfc   : > { %481 = vadd.xlane.f32.xlu0 %v480_v58  ;;  %478 = vadd.xlane.f32.xlu2 %v477_v59 }
  0xfd   : > { %475 = vadd.xlane.f32.xlu1 %v474_v60 }
 0x104   : > { %490 = vadd.xlane.f32.xlu0 %v489_v3  ;;  %487 = vadd.xlane.f32.xlu2 %v486_v4  ;;  %v505_v3 = vld [vmem:[%s2097_s4 + $0x50] sm:$0xff] }
 0x105   : > { %484 = vadd.xlane.f32.xlu1 %v483_v5 }
 0x10d   : > { %493 = vadd.xlane.f32.xlu1 %v492_v8  ;;  %v504_v8 = vld [vmem:[%s2097_s4 + $0x48] sm:$0xff] }
 0x157   : > { %v455_v12 = vpop.xlane.xlu0 %454  ;;  %v452_v13 = vpop.xlane.xlu2 %451 }
 0x158   : > { %v513_v14 = vadd.f32 %v497_v9, %v455_v12  ;;  %v512_v15 = vadd.f32 %v496_v10, %v452_v13  ;;  %v449_v16 = vpop.xlane.xlu1 %448 }
 0x159   : > { %v511_v17 = vadd.f32 %v495_v11, %v449_v16 }
 0x15a   : > { %v1075_v18 = vmul.f32 -1.442695, %v513_v14  ;;  %v1074_v19 = vmul.f32 -1.442695, %v512_v15 }
 0x15b   : > { %v1073_v21 = vmul.f32 -1.442695, %v511_v17 }
 0x15c   : > { %1150 = vpow2.f32 %v1075_v18 }
 0x15d   : > { %1152 = vpow2.f32 %v1074_v19 }
 0x15e   : > { %1154 = vpow2.f32 %v1073_v21 }
 0x15f   : > { %v464_v25 = vpop.xlane.xlu0 %463  ;;  %v461_v26 = vpop.xlane.xlu2 %460 }
 0x160   : > { %v516_v27 = vadd.f32 %v500_v22, %v464_v25  ;;  %v515_v28 = vadd.f32 %v499_v23, %v461_v26  ;;  %v458_v29 = vpop.xlane.xlu1 %457 }
 0x161   : > { %v514_v30 = vadd.f32 %v498_v24, %v458_v29 }
 0x162   : > { %v1151_v31 = vpop.eup %1150  ;;  %v1078_v32 = vmul.f32 -1.442695, %v516_v27  ;;  %v1077_v37 = vmul.f32 -1.442695, %v515_v28 }
 0x163   : > { %v1153_v33 = vpop.eup %1152  ;;  %v1658_v34 = vadd.f32 1.0, %v1151_v31  ;;  %v1076_v39 = vmul.f32 -1.442695, %v514_v30 }
 0x164   : > { %v1155_v35 = vpop.eup %1154  ;;  %v1660_v36 = vadd.f32 1.0, %v1153_v33  ;;  %1156 = vpow2.f32 %v1078_v32 }
 0x165   : > { %1158 = vrcp.f32 %v1658_v34  ;;  %v1663_v38 = vadd.f32 1.0, %v1155_v35  ;;  %v630_v45 = vand.u32 2147483647, %v1658_v34  ;;  %v632_v52 = vand.u32 2147483648, %v1658_v34 }
 0x166   : > { %1160 = vrcp.f32 %v1660_v36  ;;  %v617_v49 = vand.u32 2147483648, %v1660_v36  ;;  %v615_v51 = vand.u32 2147483647, %v1660_v36  ;;  %vm626_vm1 = vweird.f32 %v1658_v34 }
 0x167   : > { %1162 = vrcp.f32 %v1663_v38  ;;  %v473_v43 = vpop.xlane.xlu0 %472  ;;  %v470_v44 = vpop.xlane.xlu2 %469  ;;  %vm611_vm2 = vweird.f32 %v1660_v36  ;;  %v602_v59 = vand.u32 2147483648, %v1663_v38  ;;  %vm1693_vm3 = vcmp.eq.f32.partialorder %v630_v45, 8.507059e+37 }
 0x168   : > { %1164 = vpow2.f32 %v1077_v37  ;;  %v519_v46 = vadd.f32 %v503_v40, %v473_v43  ;;  %v518_v47 = vadd.f32 %v502_v41, %v470_v44  ;;  %v467_v48 = vpop.xlane.xlu1 %466  ;;  %v1689_v61 = vor.u32 1.1754944e-38, %v617_v49  ;;  %v508_v44 = vld [vmem:[%s2097_s4 + $0x68] sm:$0xff] }
 0x169   : > { %1166 = vpow2.f32 %v1076_v39  ;;  %v517_v50 = vadd.f32 %v501_v42, %v467_v48  ;;  %v600_v0 = vand.u32 2147483647, %v1663_v38  ;;  %vm1709_vm4 = vcmp.eq.f32.partialorder %v615_v51, 8.507059e+37  ;;  %v507_v48 = vld [vmem:[%s2097_s4 + $0x60] sm:$0xff] }
 0x16a   : > { %v1157_v53 = vpop.eup %1156  ;;  %v1081_v54 = vmul.f32 -1.442695, %v519_v46  ;;  %v1080_v55 = vmul.f32 -1.442695, %v518_v47  ;;  %v633_v6 = vor.u32 1.1754944e-38, %v632_v52  ;;  %vm596_vm7 = vweird.f32 %v1663_v38 }
 0x16b   : > { %v1681_v56 = vpop.eup %1158  ;;  %v1683_v57 = vadd.f32 1.0, %v1157_v53  ;;  %v1079_v58 = vmul.f32 -1.442695, %v517_v50  ;;  %v603_v16 = vor.u32 1.1754944e-38, %v602_v59  ;;  %vm1726_vm8 = vcmp.eq.f32.partialorder %v600_v0, 8.507059e+37 }
 0x16c   : > { %v1687_v60 = vpop.eup %1160  ;;  %1168 = vpow2.f32 %v1081_v54  ;;  %v622_v62 = vmul.f32 %v1681_v56, %v1658_v34  ;;  %vm627_vm5 = vweird.f32 %v1681_v56 }
 0x16d   : > { %v1698_v1 = vpop.eup %1162  ;;  %1170 = vrcp.f32 %v1683_v57  ;;  %v607_v4 = vmul.f32 %v1687_v60, %v1660_v36  ;;  %vm612_vm6 = vweird.f32 %v1687_v60  ;;  %vm628_vm10 = vmor %vm626_vm1, %vm627_vm5  ;;  %v509_v36 = vld [vmem:[%s2097_s4 + $0x70] sm:$0xff]  ;;  %v675_v52 = vand.u32 2147483647, %v1683_v57 }
 0x16e   : > { %v1165_v7 = vpop.eup %1164  ;;  %1172 = vpow2.f32 %v1080_v55  ;;  %v623_v9 = vsub.f32 1.0, %v622_v62  ;;  %v592_v10 = vmul.f32 %v1698_v1, %v1663_v38  ;;  %vm597_vm9 = vweird.f32 %v1698_v1  ;;  %vm613_vm11 = vmor %vm611_vm2, %vm612_vm6 }
 0x16f   : > { %v1167_v11 = vpop.eup %1166  ;;  %v1721_v12 = vadd.f32 1.0, %v1165_v7  ;;  %1174 = vpow2.f32 %v1079_v58  ;;  %v482_v13 = vpop.xlane.xlu0 %481  ;;  %v608_v15 = vsub.f32 1.0, %v607_v4  ;;  %vm598_vm12 = vmor %vm596_vm7, %vm597_vm9  ;;  %v677_v59 = vand.u32 2147483648, %v1683_v57 }
 0x170   : > { %v479_v14 = vpop.xlane.xlu2 %478  ;;  %v1723_v17 = vadd.f32 1.0, %v1167_v11  ;;  %v522_v18 = vadd.f32 %v506_v2, %v482_v13  ;;  %v476_v20 = vpop.xlane.xlu1 %475  ;;  %v624_v21 = vmul.f32 %v1681_v56, %v623_v9  ;;  %v593_v25 = vsub.f32 1.0, %v592_v10 }
 0x171   : > { %v521_v19 = vadd.f32 %v505_v3, %v479_v14  ;;  %v520_v23 = vadd.f32 %v504_v8, %v476_v20  ;;  %v609_v24 = vmul.f32 %v1687_v60, %v608_v15  ;;  %vm671_vm14 = vweird.f32 %v1683_v57 }
 0x172   : > { %v1169_v26 = vpop.eup %1168  ;;  %1176 = vrcp.f32 %v1723_v17  ;;  %v1084_v27 = vmul.f32 -1.442695, %v522_v18  ;;  %v625_v29 = vadd.f32 %v1681_v56, %v624_v21  ;;  %v594_v33 = vmul.f32 %v1698_v1, %v593_v25 }
 0x173   : > { %v1083_v28 = vmul.f32 -1.442695, %v521_v19  ;;  %v1734_v30 = vpop.eup %1170  ;;  %1178 = vrcp.f32 %v1721_v12  ;;  %v1737_v31 = vadd.f32 1.0, %v1169_v26  ;;  %v610_v32 = vadd.f32 %v1687_v60, %v609_v24 }
 0x174   : > { %v1173_v35 = vpop.eup %1172  ;;  %1180 = vpow2.f32 %v1084_v27  ;;  %v1082_v37 = vmul.f32 -1.442695, %v520_v23  ;;  %v629_v39 = vsel %vm628_vm10, %v1681_v56, %v625_v29  ;;  %v667_v40 = vmul.f32 %v1734_v30, %v1683_v57 }
 0x175   : > { %v1175_v41 = vpop.eup %1174  ;;  %1182 = vrcp.f32 %v1737_v31  ;;  %v1753_v34 = vadd.f32 1.0, %v1173_v35  ;;  %v614_v42 = vsel %vm613_vm11, %v1687_v60, %v610_v32  ;;  %v634_v43 = vsel %vm1693_vm3, %v633_v6, %v629_v39 }
 0x176   : > { %v1764_v45 = vadd.f32 1.0, %v1175_v41  ;;  %1184 = vpow2.f32 %v1083_v28  ;;  %v619_v46 = vsel %vm1709_vm4, %v1689_v61, %v614_v42  ;;  %843 = vperm.xlu1 %1149, %v634_v43   ;;  %v595_v47 = vadd.f32 %v1698_v1, %v594_v33 }
 0x177   : > { %1186 = vrcp.f32 %v1753_v34  ;;  %838 = vperm.xlu0 %1148, %v619_v46   ;;  %v491_v49 = vpop.xlane.xlu0 %490  ;;  %v668_v51 = vsub.f32 1.0, %v667_v40  ;;  %vm672_vm13 = vweird.f32 %v1734_v30  ;;  %vm676_vm15 = vcmp.eq.f32.partialorder %v675_v52, 8.507059e+37 }
 0x178   : > { %v488_v50 = vpop.xlane.xlu2 %487  ;;  %v1780_v53 = vpop.eup %1176  ;;  %v599_v54 = vsel %vm598_vm12, %v1698_v1, %v595_v47  ;;  %v525_v55 = vadd.f32 %v509_v36, %v491_v49  ;;  %1188 = vpow2.f32 %v1082_v37  ;;  %vm673_vm0 = vmor %vm671_vm14, %vm672_vm13  ;;  %v678_v8 = vor.u32 1.1754944e-38, %v677_v59 }
 0x179   : > { %v524_v56 = vadd.f32 %v508_v44, %v488_v50  ;;  %v485_v58 = vpop.xlane.xlu1 %484  ;;  %v1784_v60 = vpop.eup %1178  ;;  %v604_v38 = vsel %vm1726_vm8, %v603_v16, %v599_v54  ;;  %v669_v62 = vmul.f32 %v1734_v30, %v668_v51  ;;  %1190 = vrcp.f32 %v1764_v45  ;;  %v510_v16 = vld [vmem:[%s2097_s4 + $0x78] sm:$0xff] }
 0x17a   : > { %v523_v61 = vadd.f32 %v507_v48, %v485_v58  ;;  %v1181_v63 = vpop.eup %1180  ;;  %833 = vperm.xlu2 %1147, %v604_v38   ;;  %v1087_v0 = vmul.f32 -1.442695, %v525_v55  ;;  %v637_v5 = vmul.f32 %v1780_v53, %v1723_v17  ;;  %v645_v9 = vand.u32 2147483647, %v1723_v17 }
 0x17b   : > { %v1086_v1 = vmul.f32 -1.442695, %v524_v56  ;;  %v1791_v2 = vpop.eup %1182  ;;  %v1793_v3 = vadd.f32 1.0, %v1181_v63  ;;  %v670_v4 = vadd.f32 %v1734_v30, %v669_v62  ;;  %v647_v15 = vand.u32 2147483648, %v1723_v17 }
 0x17c   : > { %v1185_v6 = vpop.eup %1184  ;;  %1192 = vpow2.f32 %v1087_v0  ;;  %v1085_v7 = vmul.f32 -1.442695, %v523_v61  ;;  %v638_v13 = vsub.f32 1.0, %v637_v5  ;;  %vm642_vm1 = vweird.f32 %v1780_v53 }
 0x17d   : > { %v1801_v57 = vpop.eup %1186  ;;  %1194 = vrcp.f32 %v1793_v3  ;;  %v1804_v10 = vadd.f32 1.0, %v1185_v6  ;;  %v674_v11 = vsel %vm673_vm0, %v1734_v30, %v670_v4  ;;  %v712_v20 = vmul.f32 %v1791_v2, %v1737_v31 }
 0x17e   : > { %1196 = vpow2.f32 %v1086_v1  ;;  %v679_v14 = vsel %vm676_vm15, %v678_v8, %v674_v11  ;;  %v1189_v18 = vpop.eup %1188  ;;  %v639_v19 = vmul.f32 %v1780_v53, %v638_v13  ;;  %vm641_vm2 = vweird.f32 %v1723_v17 }
 0x17f   : > { %1198 = vrcp.f32 %v1804_v10  ;;  %858 = vperm.xlu1 %1149, %v679_v14   ;;  %v1816_v21 = vpop.eup %1190  ;;  %v1818_v22 = vadd.f32 1.0, %v1189_v18  ;;  %vm1821_vm3 = vcmp.eq.f32.partialorder %v645_v9, 8.507059e+37  ;;  %v713_v27 = vsub.f32 1.0, %v712_v20  ;;  %vm643_vm5 = vmor %vm641_vm2, %vm642_vm1 }
 0x180   : > { %1200 = vpow2.f32 %v1085_v7  ;;  %v640_v25 = vadd.f32 %v1780_v53, %v639_v19  ;;  %vm716_vm4 = vweird.f32 %v1737_v31  ;;  %v648_v29 = vor.u32 1.1754944e-38, %v647_v15 }
 0x181   : > { %v494_v24 = vpop.xlane.xlu1 %493  ;;  %vm717_vm6 = vweird.f32 %v1791_v2  ;;  %v722_v30 = vand.u32 2147483648, %v1737_v31  ;;  %v697_v17 = vmul.f32 %v1801_v57, %v1753_v34  ;;  %v714_v37 = vmul.f32 %v1791_v2, %v713_v27 }
 0x182   : > { %v526_v26 = vadd.f32 %v510_v16, %v494_v24  ;;  %v1193_v28 = vpop.eup %1192  ;;  %v644_v33 = vsel %vm643_vm5, %v1780_v53, %v640_v25  ;;  %v720_v39 = vand.u32 2147483647, %v1737_v31  ;;  %1202 = vrcp.f32 %v1818_v22  ;;  %vm718_vm8 = vmor %vm716_vm4, %vm717_vm6 }
 0x183   : > { %v1831_v32 = vpop.eup %1194  ;;  %v1837_v41 = vadd.f32 1.0, %v1193_v28  ;;  %v649_v42 = vsel %vm1821_vm3, %v648_v29, %v644_v33  ;;  %v698_v43 = vsub.f32 1.0, %v697_v17  ;;  %v715_v46 = vadd.f32 %v1791_v2, %v714_v37 }
 0x184   : > { %v1088_v35 = vmul.f32 -1.442695, %v526_v26  ;;  %v1197_v40 = vpop.eup %1196  ;;  %848 = vperm.xlu2 %1147, %v649_v42   ;;  %v723_v47 = vor.u32 1.1754944e-38, %v722_v30  ;;  %vm702_vm7 = vweird.f32 %v1801_v57  ;;  %v705_v50 = vand.u32 2147483647, %v1753_v34 }
 0x185   : > { %v1841_v36 = vpop.eup %1198  ;;  %v1843_v44 = vadd.f32 1.0, %v1197_v40  ;;  %v699_v49 = vmul.f32 %v1801_v57, %v698_v43  ;;  %v707_v51 = vand.u32 2147483648, %v1753_v34  ;;  %v719_v52 = vsel %vm718_vm8, %v1791_v2, %v715_v46 }
 0x186   : > { %v1201_v48 = vpop.eup %1200  ;;  %1204 = vpow2.f32 %v1088_v35  ;;  %vm721_vm9 = vcmp.eq.f32.partialorder %v720_v39, 8.507059e+37  ;;  %vm701_vm10 = vweird.f32 %v1753_v34  ;;  %v652_v53 = vmul.f32 %v1784_v60, %v1721_v12  ;;  %v1219_v39 = vld [vmem:[%s1471_s25 + $0x10] sm:$0xff] }
 0x187   : > { %1206 = vrcp.f32 %v1837_v41  ;;  %v1859_v54 = vadd.f32 1.0, %v1201_v48  ;;  %v724_v31 = vsel %vm721_vm9, %v723_v47, %v719_v52  ;;  %v700_v55 = vadd.f32 %v1801_v57, %v699_v49  ;;  %vm703_vm11 = vmor %vm701_vm10, %vm702_vm7 }
 0x188   : > { %1208 = vrcp.f32 %v1843_v44  ;;  %873 = vperm.xlu0 %1148, %v724_v31   ;;  %v708_v56 = vor.u32 1.1754944e-38, %v707_v51  ;;  %v653_v58 = vsub.f32 1.0, %v652_v53  ;;  %v1865_v59 = vpop.eup %1202  ;;  %vm706_vm12 = vcmp.eq.f32.partialorder %v705_v50, 8.507059e+37 }
 0x189   : > { %v704_v34 = vsel %vm703_vm11, %v1801_v57, %v700_v55  ;;  %v662_v38 = vand.u32 2147483648, %v1721_v12  ;;  %v757_v61 = vmul.f32 %v1831_v32, %v1793_v3  ;;  %vm657_vm13 = vweird.f32 %v1784_v60 }
 0x18a   : > { %v709_v62 = vsel %vm706_vm12, %v708_v56, %v704_v34  ;;  %v654_v63 = vmul.f32 %v1784_v60, %v653_v58  ;;  %v660_v0 = vand.u32 2147483647, %v1721_v12  ;;  %1210 = vrcp.f32 %v1859_v54 }
 0x18b   : > { %868 = vperm.xlu1 %1149, %v709_v62   ;;  %vm656_vm14 = vweird.f32 %v1721_v12  ;;  %v758_v2 = vsub.f32 1.0, %v757_v61  ;;  %v765_v4 = vand.u32 2147483647, %v1793_v3  ;;  %vm761_vm15 = vweird.f32 %v1793_v3 }
 0x18c   : > { %v1205_v1 = vpop.eup %1204  ;;  %v655_v5 = vadd.f32 %v1784_v60, %v654_v63  ;;  %v767_v6 = vand.u32 2147483648, %v1793_v3  ;;  %v742_v7 = vmul.f32 %v1841_v36, %v1804_v10  ;;  %vm658_vm0 = vmor %vm656_vm14, %vm657_vm13  ;;  %v663_v57 = vor.u32 1.1754944e-38, %v662_v38 }
 0x18d   : > { %v1882_v8 = vpop.eup %1206  ;;  %v1884_v9 = vadd.f32 1.0, %v1205_v1  ;;  %v759_v12 = vmul.f32 %v1831_v32, %v758_v2  ;;  %vm762_vm1 = vweird.f32 %v1831_v32  ;;  %vm661_vm2 = vcmp.eq.f32.partialorder %v660_v0, 8.507059e+37 }
 0x18e   : > { %v1888_v11 = vpop.eup %1208  ;;  %v659_v13 = vsel %vm658_vm0, %v1784_v60, %v655_v5  ;;  %vm1891_vm3 = vcmp.eq.f32.partialorder %v765_v4, 8.507059e+37  ;;  %v743_v15 = vsub.f32 1.0, %v742_v7  ;;  %vm747_vm4 = vweird.f32 %v1841_v36  ;;  %vm763_vm5 = vmor %vm761_vm15, %vm762_vm1 }
 0x18f   : > { %v664_v16 = vsel %vm661_vm2, %v663_v57, %v659_v13  ;;  %v760_v18 = vadd.f32 %v1831_v32, %v759_v12  ;;  %v752_v19 = vand.u32 2147483648, %v1804_v10  ;;  %v768_v20 = vor.u32 1.1754944e-38, %v767_v6 }
 0x190   : > { %853 = vperm.xlu2 %1147, %v664_v16   ;;  %v744_v60 = vmul.f32 %v1841_v36, %v743_v15  ;;  %v750_v23 = vand.u32 2147483647, %v1804_v10  ;;  %v682_v24 = vmul.f32 %v1816_v21, %v1764_v45  ;;  %v1904_v25 = vpop.eup %1210  ;;  %1212 = vrcp.f32 %v1884_v9 }
 0x191   : > { %v764_v26 = vsel %vm763_vm5, %v1831_v32, %v760_v18  ;;  %vm746_vm6 = vweird.f32 %v1804_v10  ;;  %v690_v27 = vand.u32 2147483647, %v1764_v45  ;;  %vm686_vm7 = vweird.f32 %v1764_v45 }
 0x192   : > { %v769_v3 = vsel %vm1891_vm3, %v768_v20, %v764_v26  ;;  %v745_v28 = vadd.f32 %v1841_v36, %v744_v60  ;;  %v683_v29 = vsub.f32 1.0, %v682_v24  ;;  %vm748_vm8 = vmor %vm746_vm6, %vm747_vm4  ;;  %v753_v30 = vor.u32 1.1754944e-38, %v752_v19  ;;  %v1214_v26 = vld [vmem:[%s1471_s25] sm:$0xff] }
 0x193   : > { %888 = vperm.xlu0 %1148, %v769_v3   ;;  %vm687_vm9 = vweird.f32 %v1816_v21  ;;  %v692_v17 = vand.u32 2147483648, %v1764_v45  ;;  %v802_v10 = vmul.f32 %v1882_v8, %v1837_v41  ;;  %vm751_vm10 = vcmp.eq.f32.partialorder %v750_v23, 8.507059e+37  ;;  %v1215_v3 = vld [vmem:[%s1471_s25 + $0x8] sm:$0xff] }
 0x194   : > { %v749_v32 = vsel %vm748_vm8, %v1841_v36, %v745_v28  ;;  %v684_v33 = vmul.f32 %v1816_v21, %v683_v29  ;;  %v810_v35 = vand.u32 2147483647, %v1837_v41  ;;  %vm1923_vm11 = vcmp.eq.f32.partialorder %v690_v27, 8.507059e+37  ;;  %vm688_vm14 = vmor %vm686_vm7, %vm687_vm9  ;;  %v1216_v29 = vld [vmem:[%s1471_s25 + $0x30] sm:$0xff] }
 0x195   : > { %v754_v37 = vsel %vm751_vm10, %v753_v30, %v749_v32  ;;  %v803_v40 = vsub.f32 1.0, %v802_v10  ;;  %v787_v42 = vmul.f32 %v1888_v11, %v1843_v44  ;;  %vm806_vm12 = vweird.f32 %v1837_v41 }
 0x196   : > { %883 = vperm.xlu1 %1149, %v754_v37   ;;  %v685_v43 = vadd.f32 %v1816_v21, %v684_v33  ;;  %vm807_vm13 = vweird.f32 %v1882_v8  ;;  %v812_v36 = vand.u32 2147483648, %v1837_v41  ;;  %v1933_v46 = vpop.eup %1212  ;;  %v693_v47 = vor.u32 1.1754944e-38, %v692_v17  ;;  %v1217_v17 = vld [vmem:[%s1471_s25 + $0x38] sm:$0xff] }
 0x197   : > { %v804_v48 = vmul.f32 %v1882_v8, %v803_v40  ;;  %vm1940_vm15 = vcmp.eq.f32.partialorder %v810_v35, 8.507059e+37  ;;  %v788_v50 = vsub.f32 1.0, %v787_v42  ;;  %vm792_vm0 = vweird.f32 %v1888_v11  ;;  %vm808_vm1 = vmor %vm806_vm12, %vm807_vm13  ;;  %v1218_v35 = vld [vmem:[%s1471_s25 + $0x20] sm:$0xff]  ;;  %v1220_v42 = vld [vmem:[%s1471_s25 + $0x18] sm:$0xff] }
 0x198   : > { %v689_v51 = vsel %vm688_vm14, %v1816_v21, %v685_v43  ;;  %v797_v52 = vand.u32 2147483648, %v1843_v44  ;;  %v727_v53 = vmul.f32 %v1865_v59, %v1818_v22  ;;  %v795_v56 = vand.u32 2147483647, %v1843_v44 }
 0x199   : > { %v694_v45 = vsel %vm1923_vm11, %v693_v47, %v689_v51  ;;  %v805_v31 = vadd.f32 %v1882_v8, %v804_v48  ;;  %v789_v55 = vmul.f32 %v1888_v11, %v788_v50  ;;  %v813_v21 = vor.u32 1.1754944e-38, %v812_v36  ;;  %v1222_v48 = vld [vmem:[%s1471_s25 + $0x48] sm:$0xff] }
 0x19a   : > { %863 = vperm.xlu2 %1147, %v694_v45   ;;  %vm791_vm2 = vweird.f32 %v1843_v44  ;;  %v798_v58 = vor.u32 1.1754944e-38, %v797_v52  ;;  %v728_v34 = vsub.f32 1.0, %v727_v53  ;;  %v737_v62 = vand.u32 2147483648, %v1818_v22  ;;  %v1223_v50 = vld [vmem:[%s1471_s25 + $0x28] sm:$0xff]  ;;  %v1224_v53 = vld [vmem:[%s1471_s25 + $0x50] sm:$0xff] }
 0x19b   : > { %v809_v38 = vsel %vm808_vm1, %v1882_v8, %v805_v31  ;;  %v790_v61 = vadd.f32 %v1888_v11, %v789_v55  ;;  %v772_v63 = vmul.f32 %v1904_v25, %v1859_v54  ;;  %vm793_vm3 = vmor %vm791_vm2, %vm792_vm0  ;;  %vm732_vm4 = vweird.f32 %v1865_v59  ;;  %v1225_v31 = vld [vmem:[%s1471_s25 + $0x58] sm:$0xff] }
 0x19c   : > { %v814_v0 = vsel %vm1940_vm15, %v813_v21, %v809_v38  ;;  %v729_v41 = vmul.f32 %v1865_v59, %v728_v34  ;;  %v735_v44 = vand.u32 2147483647, %v1818_v22  ;;  %vm796_vm5 = vcmp.eq.f32.partialorder %v795_v56, 8.507059e+37  ;;  %v1226_v21 = vld [vmem:[%s1471_s25 + $0x60] sm:$0xff]  ;;  %v1227_v34 = vld [vmem:[%s1471_s25 + $0x68] sm:$0xff] }
 0x19d   : > { %903 = vperm.xlu0 %1148, %v814_v0   ;;  %v794_v1 = vsel %vm793_vm3, %v1888_v11, %v790_v61  ;;  %v773_v2 = vsub.f32 1.0, %v772_v63  ;;  %vm731_vm6 = vweird.f32 %v1818_v22  ;;  %v738_v6 = vor.u32 1.1754944e-38, %v737_v62  ;;  %v1228_v62 = vld [vmem:[%s1471_s25 + $0x80] sm:$0xff]  ;;  %v1229_v0 = vld [vmem:[%s1471_s25 + $0x88] sm:$0xff] }
 0x19e   : > { %v799_v4 = vsel %vm796_vm5, %v798_v58, %v794_v1  ;;  %v730_v5 = vadd.f32 %v1865_v59, %v729_v41  ;;  %vm733_vm7 = vmor %vm731_vm6, %vm732_vm4  ;;  %v817_v8 = vmul.f32 %v1933_v46, %v1884_v9  ;;  %vm736_vm8 = vcmp.eq.f32.partialorder %v735_v44, 8.507059e+37  ;;  %v1230_v1 = vld [vmem:[%s1471_s25 + $0x90] sm:$0xff] }
 0x19f   : > { %898 = vperm.xlu1 %1149, %v799_v4   ;;  %v774_v7 = vmul.f32 %v1904_v25, %v773_v2  ;;  %vm777_vm9 = vweird.f32 %v1904_v25  ;;  %v782_v22 = vand.u32 2147483648, %v1859_v54  ;;  %vm776_vm10 = vweird.f32 %v1859_v54  ;;  %v1231_v4 = vld [vmem:[%s1471_s25 + $0x98] sm:$0xff] }
 0x1a0   : > { %v734_v57 = vsel %vm733_vm7, %v1865_v59, %v730_v5  ;;  %v818_v13 = vsub.f32 1.0, %v817_v8  ;;  %v780_v14 = vand.u32 2147483647, %v1859_v54  ;;  %vm778_vm11 = vmor %vm776_vm10, %vm777_vm9  ;;  %vm822_vm13 = vweird.f32 %v1933_v46 }
 0x1a1   : > { %v739_v12 = vsel %vm736_vm8, %v738_v6, %v734_v57  ;;  %v775_v11 = vadd.f32 %v1904_v25, %v774_v7  ;;  %v783_v59 = vor.u32 1.1754944e-38, %v782_v22  ;;  %v827_v20 = vand.u32 2147483648, %v1884_v9  ;;  %v1232_v7 = vld [vmem:[%s1471_s25 + $0x70] sm:$0xff]  ;;  %v1233_v57 = vld [vmem:[%s1471_s25 + $0x78] sm:$0xff] }
 0x1a2   : > { %878 = vperm.xlu2 %1147, %v739_v12   ;;  %v819_v16 = vmul.f32 %v1933_v46, %v818_v13  ;;  %vm781_vm12 = vcmp.eq.f32.partialorder %v780_v14, 8.507059e+37  ;;  %vm821_vm14 = vweird.f32 %v1884_v9  ;;  %v825_v54 = vand.u32 2147483647, %v1884_v9  ;;  %v1234_v13 = vld [vmem:[%s1471_s25 + $0xc0] sm:$0xff]  ;;  %v1235_v14 = vld [vmem:[%s1471_s25 + $0xc8] sm:$0xff] }
 0x1a3   : > { %v779_v15 = vsel %vm778_vm11, %v1904_v25, %v775_v11  ;;  %vm823_vm15 = vmor %vm821_vm14, %vm822_vm13  ;;  %v828_v23 = vor.u32 1.1754944e-38, %v827_v20 }
 0x1a4   : > { %v784_v18 = vsel %vm781_vm12, %v783_v59, %v779_v15  ;;  %v820_v19 = vadd.f32 %v1933_v46, %v819_v16  ;;  %vm826_vm0 = vcmp.eq.f32.partialorder %v825_v54, 8.507059e+37  ;;  %v1236_v59 = vld [vmem:[%s1471_s25 + $0xb0] sm:$0xff] }
 0x1a6   : > { %v824_v60 = vsel %vm823_vm15, %v1933_v46, %v820_v19  ;;  %v1221_v46 = vld [vmem:[%s1471_s25 + $0x40] sm:$0xff]  ;;  %v1237_v19 = vld [vmem:[%s1471_s25 + $0xb8] sm:$0xff] }
 0x1a7   : > { %v829_v24 = vsel %vm826_vm0, %v828_v23, %v824_v60  ;;  %v1238_v60 = vld [vmem:[%s1471_s25 + $0xa0] sm:$0xff] }
 0x1aa   : > { %893 = vperm.xlu2 %1147, %v784_v18  }
 0x1b2   : > { %908 = vperm.xlu2 %1147, %v829_v24   ;;  %v1239_v24 = vld [vmem:[%s1471_s25 + $0xa8] sm:$0xff] }
 0x1d4   : > { %v834_v25 = vpop.permute.xlu2 %833 }
 0x1d5   : > { %v911_v27 = vmul.f32 %v1214_v26, %v834_v25  ;;  %v912_v28 = vmul.f32 %v1215_v3, %v834_v25 }
 0x1d7   : > { %943 = vst [vmem:[%s1995_s28] sm:$0xff] %v911_v27  ;;  %v1240_v27 = vld [vmem:[%s1471_s25 + $0xf0] sm:$0xff] }
 0x1d8   : > { %944 = vst [vmem:[%s1995_s28 + $0x8] sm:$0xff] %v912_v28  ;;  %v1241_v28 = vld [vmem:[%s1471_s25 + $0xf8] sm:$0xff] }
 0x1de   : > { %v849_v9 = vpop.permute.xlu2 %848 }
 0x1df   : > { %v917_v30 = vmul.f32 %v1216_v29, %v849_v9  ;;  %v918_v10 = vmul.f32 %v1217_v17, %v849_v9 }
 0x1e1   : > { %949 = vst [vmem:[%s1995_s28 + $0x30] sm:$0xff] %v917_v30  ;;  %v1242_v30 = vld [vmem:[%s1471_s25 + $0xe0] sm:$0xff] }
 0x1e2   : > { %950 = vst [vmem:[%s1995_s28 + $0x38] sm:$0xff] %v918_v10  ;;  %v1243_v10 = vld [vmem:[%s1471_s25 + $0xe8] sm:$0xff] }
 0x1e8   : > { %v844_v32 = vpop.permute.xlu1 %843 }
 0x1e9   : > { %v839_v33 = vpop.permute.xlu0 %838  ;;  %v915_v37 = vmul.f32 %v1218_v35, %v844_v32  ;;  %v916_v51 = vmul.f32 %v1223_v50, %v844_v32  ;;  %v1244_v35 = vld [vmem:[%s1471_s25 + $0xd0] sm:$0xff] }
 0x1ea   : > { %v913_v40 = vmul.f32 %v1219_v39, %v839_v33  ;;  %v914_v43 = vmul.f32 %v1220_v42, %v839_v33  ;;  %v854_v36 = vpop.permute.xlu2 %853  ;;  %v1245_v39 = vld [vmem:[%s1471_s25 + $0xd8] sm:$0xff] }
 0x1eb   : > { %947 = vst [vmem:[%s1995_s28 + $0x20] sm:$0xff] %v915_v37  ;;  %v919_v47 = vmul.f32 %v1221_v46, %v854_v36  ;;  %v920_v49 = vmul.f32 %v1222_v48, %v854_v36 }
 0x1ec   : > { %945 = vst [vmem:[%s1995_s28 + $0x10] sm:$0xff] %v913_v40 }
 0x1ed   : > { %946 = vst [vmem:[%s1995_s28 + $0x18] sm:$0xff] %v914_v43 }
 0x1ee   : > { %951 = vst [vmem:[%s1995_s28 + $0x40] sm:$0xff] %v919_v47 }
 0x1ef   : > { %952 = vst [vmem:[%s1995_s28 + $0x48] sm:$0xff] %v920_v49 }
 0x1f0   : > { %948 = vst [vmem:[%s1995_s28 + $0x28] sm:$0xff] %v916_v51 }
 0x1f1   : > { %v859_v52 = vpop.permute.xlu1 %858 }
 0x1f2   : > { %v921_v45 = vmul.f32 %v1224_v53, %v859_v52  ;;  %v922_v55 = vmul.f32 %v1225_v31, %v859_v52 }
 0x1f4   : > { %953 = vst [vmem:[%s1995_s28 + $0x50] sm:$0xff] %v921_v45  ;;  %v864_v56 = vpop.permute.xlu2 %863 }
 0x1f5   : > { %954 = vst [vmem:[%s1995_s28 + $0x58] sm:$0xff] %v922_v55  ;;  %v923_v58 = vmul.f32 %v1226_v21, %v864_v56  ;;  %v924_v38 = vmul.f32 %v1227_v34, %v864_v56 }
 0x1f7   : > { %955 = vst [vmem:[%s1995_s28 + $0x60] sm:$0xff] %v923_v58 }
 0x1f8   : > { %956 = vst [vmem:[%s1995_s28 + $0x68] sm:$0xff] %v924_v38 }
 0x1fa   : > { %v874_v61 = vpop.permute.xlu0 %873 }
 0x1fb   : > { %v927_v63 = vmul.f32 %v1228_v62, %v874_v61  ;;  %v928_v41 = vmul.f32 %v1229_v0, %v874_v61 }
 0x1fc   : > { %v879_v44 = vpop.permute.xlu2 %878 }
 0x1fd   : > { %v929_v2 = vmul.f32 %v1230_v1, %v879_v44  ;;  %v930_v5 = vmul.f32 %v1231_v4, %v879_v44  ;;  %959 = vst [vmem:[%s1995_s28 + $0x80] sm:$0xff] %v927_v63  ;;  %v869_v6 = vpop.permute.xlu1 %868 }
 0x1fe   : > { %960 = vst [vmem:[%s1995_s28 + $0x88] sm:$0xff] %v928_v41  ;;  %v925_v8 = vmul.f32 %v1232_v7, %v869_v6  ;;  %v926_v12 = vmul.f32 %v1233_v57, %v869_v6 }
 0x1ff   : > { %961 = vst [vmem:[%s1995_s28 + $0x90] sm:$0xff] %v929_v2 }
 0x200   : > { %962 = vst [vmem:[%s1995_s28 + $0x98] sm:$0xff] %v930_v5 }
 0x201   : > { %957 = vst [vmem:[%s1995_s28 + $0x70] sm:$0xff] %v925_v8 }
 0x202   : > { %958 = vst [vmem:[%s1995_s28 + $0x78] sm:$0xff] %v926_v12 }
 0x204   : > { %v894_v11 = vpop.permute.xlu2 %893 }
 0x205   : > { %v935_v22 = vmul.f32 %v1234_v13, %v894_v11  ;;  %v936_v15 = vmul.f32 %v1235_v14, %v894_v11  ;;  %v889_v16 = vpop.permute.xlu0 %888 }
 0x206   : > { %v933_v18 = vmul.f32 %v1236_v59, %v889_v16  ;;  %v934_v20 = vmul.f32 %v1237_v19, %v889_v16 }
 0x207   : > { %967 = vst [vmem:[%s1995_s28 + $0xc0] sm:$0xff] %v935_v22 }
 0x208   : > { %968 = vst [vmem:[%s1995_s28 + $0xc8] sm:$0xff] %v936_v15  ;;  %v884_v54 = vpop.permute.xlu1 %883 }
 0x209   : > { %965 = vst [vmem:[%s1995_s28 + $0xb0] sm:$0xff] %v933_v18  ;;  %v931_v23 = vmul.f32 %v1238_v60, %v884_v54  ;;  %v932_v25 = vmul.f32 %v1239_v24, %v884_v54 }
 0x20a   : > { %966 = vst [vmem:[%s1995_s28 + $0xb8] sm:$0xff] %v934_v20 }
 0x20b   : > { %963 = vst [vmem:[%s1995_s28 + $0xa0] sm:$0xff] %v931_v23 }
 0x20c   : > { %v909_v26 = vpop.permute.xlu2 %908  ;;  %964 = vst [vmem:[%s1995_s28 + $0xa8] sm:$0xff] %v932_v25 }
 0x20d   : > { %v941_v3 = vmul.f32 %v1240_v27, %v909_v26  ;;  %v942_v9 = vmul.f32 %v1241_v28, %v909_v26 }
 0x20f   : > { %973 = vst [vmem:[%s1995_s28 + $0xf0] sm:$0xff] %v941_v3  ;;  %v904_v29 = vpop.permute.xlu0 %903 }
 0x210   : > { %974 = vst [vmem:[%s1995_s28 + $0xf8] sm:$0xff] %v942_v9  ;;  %v939_v17 = vmul.f32 %v1242_v30, %v904_v29  ;;  %v940_v32 = vmul.f32 %v1243_v10, %v904_v29 }
 0x211   : > { %v899_v33 = vpop.permute.xlu1 %898 }
 0x212   : > { %971 = vst [vmem:[%s1995_s28 + $0xe0] sm:$0xff] %v939_v17  ;;  %v937_v37 = vmul.f32 %v1244_v35, %v899_v33  ;;  %v938_v40 = vmul.f32 %v1245_v39, %v899_v33 }
 0x213   : > { %972 = vst [vmem:[%s1995_s28 + $0xe8] sm:$0xff] %v940_v32 }
 0x214   : > { %969 = vst [vmem:[%s1995_s28 + $0xd0] sm:$0xff] %v937_v37 }
 0x215   : > { %970 = vst [vmem:[%s1995_s28 + $0xd8] sm:$0xff] %v938_v40 }
 0x216   : > { %1303 = shalt.err (!%p1300_p4)
}
 0x217   : > { %s1347_s12 = smov 256   ;;  %s1348_s8 = smov 16  }
 0x218   : > { %1098 = dma.vmem_to_hbm [thread:$0]  (%p1429_p11), %s989_s22, 4096, %s991_s11, %s976_s23, %s1347_s12, %s1347_s12, %s1348_s8  }
 0x219 PF: > { %s1005_s28 = sand.u32 1, %s1330_s18   ;;  %p2118_p7 = scmp.ge.s32.totalorder %s1342_s21, 2 }
 0x21a   : > { %s1006_s14 = scalar_lea.sflag [#allocation4], %s1005_s28 }
 0x21b   : > { %p1105_p5 = pnand %p2118_p7, %p1433_p12 }
 0x21d   : > { %p1106_p8 = pneg %p1105_p5 }
 0x21f   : > { %1325 = dma.done.wait (%p1106_p8), %s1006_s14, 4096  }
 0x220   : > { %1327 = vsyncadd (%p1106_p8), %s1006_s14, 4294963200  ;;  %p18_p10 = scmp.ge.s32.totalorder %s1404_s24, 4   ;;  %s2119_s18 = smov %s1334_s19 }
 0x221   : > { %s2120_s19 = smov %s1338_s20  ;;  %s2121_s20 = smov %s1416_s27 }
 0x222   : > { %s2122_s21 = smov %s1404_s24  ;;  %20 = sbr.rel (!%p18_p10) target bundleno = 5 (0x5), region = 85 }
 0x227   :  { %1012 = vsyncpa [#allocation3], 1 }
 0x228   :  { %1014 = vsyncpa [#allocation3 + $0x1], 1 }
 0x229   :  { %1015 = vsyncpa [#allocation4], 1 }
 0x22a   :  { %1017 = vsyncpa [#allocation4 + $0x1], 1 }

</bundles_post_ra>
